<compile_context>
chip_gen: v6e
topology: v6e:2x2x1
jax: 0.10.0
libtpu: 0.0.40
codegen_flags: <defaults>
</compile_context>

<pallas_src>
import math

import jax
import jax.numpy as jnp
from jax import lax
from jax.experimental import pallas as pl
from jax.experimental.pallas import tpu as pltpu


def find_multiple(n: int, k: int) -> int:
    if n % k == 0:
        return n
    return n + k - (n % k)


def _make_rmsnorm_kernel(eps: float):
    def rmsnorm_kernel(x_ref, scale_ref, o_ref):
        # x_ref: (tile, D)   scale_ref: (1, D)   o_ref: (tile, D)
        x = x_ref[...].astype(jnp.float32)
        ms = jnp.mean(x * x, axis=-1, keepdims=True)            # (tile, 1), XLU reduce
        inv = lax.rsqrt(ms + eps)                                # EUP rsqrt
        scale = scale_ref[...].astype(jnp.float32)               # (1, D), broadcasts
        o_ref[...] = (x * inv * scale).astype(o_ref.dtype)

    return rmsnorm_kernel


def rmsnorm_pallas(x, scale, *, eps: float = 1e-5, tm: int = 1024):
    """RMSNorm over the last dim. x: (..., D); scale: (D,)."""
    orig_shape = x.shape
    D = orig_shape[-1]
    M = math.prod(orig_shape[:-1]) if len(orig_shape) > 1 else 1
    x2d = x.reshape(M, D)
    scale2d = scale.reshape(1, D)

    itemsize = jnp.dtype(x.dtype).itemsize

    # Row-tile selection: as large as possible (amortize per-step overhead,
    # fill the VPU), capped so double-buffered (in + out) tiles stay inside a
    # conservative 16 MiB budget (safe under the default scoped VMEM limit on
    # v5e/v6e and v7x's smaller 64 MiB physical VMEM).
    vmem_budget = 16 * (1 << 20)
    # 4 = 2 (double buffer) * 2 (input tile + output tile)
    max_rows = max(8, vmem_budget // (4 * D * itemsize))
    max_rows = (max_rows // 8) * 8
    tile = min(tm, max_rows)
    if M < tile:
        tile = find_multiple(M, 8)                # small inputs: a single block

    Mp = find_multiple(M, tile)
    if Mp != M:
        x2d = jnp.pad(x2d, ((0, Mp - M), (0, 0)))

    grid = (Mp // tile,)

    cost = pl.CostEstimate(
        flops=4 * Mp * D,                 # square + reduce + normalize + scale
        transcendentals=Mp,               # one rsqrt per row
        bytes_accessed=(2 * Mp * D + D) * itemsize,
    )

    out = pl.pallas_call(
        _make_rmsnorm_kernel(eps),
        out_shape=jax.ShapeDtypeStruct((Mp, D), x.dtype),
        grid_spec=pltpu.PrefetchScalarGridSpec(
            num_scalar_prefetch=0,
            grid=grid,
            in_specs=[
                pl.BlockSpec((tile, D), lambda i: (i, 0)),
                pl.BlockSpec((1, D), lambda i: (0, 0)),
            ],
            out_specs=pl.BlockSpec((tile, D), lambda i: (i, 0)),
        ),
        compiler_params=pltpu.CompilerParams(
            dimension_semantics=("parallel",),
        ),
        cost_estimate=cost,
    )(x2d, scale2d)

    if Mp != M:
        out = out[:M]
    return out.reshape(orig_shape)


def rmsnorm_reference(x, scale, eps: float = 1e-5):
    ms = jnp.mean(x * x, axis=-1, keepdims=True)
    return scale * (x * lax.rsqrt(ms + eps))


if __name__ == "__main__":
    # Small config consistent with the module: batch=2, seq=8, feature size=256.
    B, S, D = 2, 8, 256
    eps = 1e-5

    key = jax.random.PRNGKey(0)
    kx, ks = jax.random.split(key)

    x = jax.random.normal(kx, (B, S, D), jnp.float32)
    # The module initializes scale to ones; use a deterministic non-trivial
    # scale to exercise the scaling path.
    scale = jax.random.uniform(ks, (D,), jnp.float32, 0.5, 1.5)

    y = rmsnorm_pallas(x, scale, eps=eps)
    y = jax.block_until_ready(y)

    y_ref = rmsnorm_reference(x, scale, eps=eps)
    assert y.shape == x.shape
    assert jnp.allclose(y, y_ref, atol=1e-4, rtol=1e-4), "mismatch vs reference"

    print("KERNEL_OK")
</pallas_src>

<mosaic_0001>
module attributes {stable_mosaic.version = 11 : i64} {
  func.func @rmsnorm_kernel(%arg0: i32, %arg1: memref<16x256xf32, #tpu.memory_space<vmem>>, %arg2: memref<1x256xf32, #tpu.memory_space<vmem>>, %arg3: memref<16x256xf32, #tpu.memory_space<vmem>>) attributes {dimension_semantics = [#tpu.dimension_semantics<parallel>], iteration_bounds = array<i64: 1>, scalar_prefetch = 0 : i64, scratch_operands = 0 : i64, tpu.core_type = #tpu.core_type<tc>, window_params = [{transform_indices = @transform_0, window_bounds = array<i64: 16, 256>}, {pipeline_mode = #tpu.pipeline_mode<synchronous>, transform_indices = @transform_1, window_bounds = array<i64: 1, 256>}, {transform_indices = @transform_2, window_bounds = array<i64: 16, 256>}]} {
    %c0 = arith.constant 0 : index
    %c0_0 = arith.constant 0 : index
    %0 = vector.load %arg1[%c0, %c0_0] : memref<16x256xf32, #tpu.memory_space<vmem>>, vector<16x256xf32>
    %1 = arith.mulf %0, %0 : vector<16x256xf32>
    %cst = arith.constant dense<0.000000e+00> : vector<16xf32>
    %2 = vector.multi_reduction <add>, %1, %cst [1] : vector<16x256xf32> to vector<16xf32>
    %3 = vector.shape_cast %2 : vector<16xf32> to vector<16x1xf32>
    %cst_1 = arith.constant 2.560000e+02 : f32
    %4 = vector.broadcast %cst_1 : f32 to vector<16x1xf32>
    %5 = arith.divf %3, %4 : vector<16x1xf32>
    %cst_2 = arith.constant 9.99999974E-6 : f32
    %6 = vector.broadcast %cst_2 : f32 to vector<16x1xf32>
    %7 = arith.addf %5, %6 : vector<16x1xf32>
    %8 = math.rsqrt %7 : vector<16x1xf32>
    %c0_3 = arith.constant 0 : index
    %c0_4 = arith.constant 0 : index
    %9 = vector.load %arg2[%c0_3, %c0_4] : memref<1x256xf32, #tpu.memory_space<vmem>>, vector<1x256xf32>
    %10 = vector.broadcast %8 : vector<16x1xf32> to vector<16x256xf32>
    %11 = arith.mulf %0, %10 : vector<16x256xf32>
    %12 = vector.broadcast %9 : vector<1x256xf32> to vector<16x256xf32>
    %13 = arith.mulf %11, %12 : vector<16x256xf32>
    %c0_5 = arith.constant 0 : index
    %c0_6 = arith.constant 0 : index
    %14 = vector.load %arg3[%c0_5, %c0_6] : memref<16x256xf32, #tpu.memory_space<vmem>>, vector<16x256xf32>
    tpu.vector_store %arg3[%c0_5, %c0_6], %13 {strides = array<i32>} : memref<16x256xf32, #tpu.memory_space<vmem>>, vector<16x256xf32>,
    return
  }
  func.func @transform_0(%arg0: i32) -> (i32, i32) {
    %c0_i32 = arith.constant 0 : i32
    %c0_i32_0 = arith.constant 0 : i32
    return %arg0, %c0_i32 : i32, i32
  }
  func.func @transform_1(%arg0: i32) -> (i32, i32) {
    %c0_i32 = arith.constant 0 : i32
    %c0_i32_0 = arith.constant 0 : i32
    %c0_i32_1 = arith.constant 0 : i32
    return %c0_i32, %c0_i32_0 : i32, i32
  }
  func.func @transform_2(%arg0: i32) -> (i32, i32) {
    %c0_i32 = arith.constant 0 : i32
    %c0_i32_0 = arith.constant 0 : i32
    return %arg0, %c0_i32 : i32, i32
  }
}

</mosaic_0001>

<bundles_post_ra>
// kernel: tpu_custom_call.1
= control target key start
LH: loop header
LB: loop body
LE: loop exit
PB: predicated region body
PF: predicated region fallthrough
CT: control target
= control target key end

     0   :  { %7 = vsyncpa [#allocation3], 0  ;;  %s211_s0 = inlined_call_operand.hbm [shape: f32[16,256], index: 0, kind: input, shape index: {}]   ;;  %s212_s1 = inlined_call_operand.hbm [shape: f32[1,256], index: 1, kind: input, shape index: {}]   ;;  %s213_s2 = inlined_call_operand.hbm [shape: f32[16,256], index: 2, kind: output, shape index: {}]  }
   0x1   :  { %8 = vsyncpa [#allocation6], 0 }
   0x2   :  { %9 = vsyncpa [#allocation4], 0  ;;  %s176_s9 = smov [#allocation2]  }
   0x3   :  { %s15_s10 = sshll.u32 %s176_s9, 4  ;;  %s16_s10 = int_to_ptr.vmem [resolvable:$true] %s15_s10 }
   0x4   :  { %s118_s11 = scalar_lea.vmem %s16_s10, 512  ;;  %p123_p1 = scmp.lt.s32.totalorder %s16_s10, %s16_s10 }
   0x5   :  { %p119_p0 = scmp.ne.s32.totalorder %s16_s10, %s118_s11  ;;  %p124_p2 = scmp.lt.s32.totalorder %s118_s11, %s118_s11 }
   0x7   :  { %p125_p3 = por %p124_p2, %p123_p1 }
   0x9   :  { %p126_p4 = pnand %p125_p3, %p119_p0 }
   0xb   :  { %129 = shalt.err (!%p126_p4)
}
   0xc   :  { %s177_s12 = smov 256   ;;  %s178_s13 = smov 16  }
   0xd   :  { %21 = dma.hbm_to_vmem [thread:$0]  %s211_s0, 512, %s16_s10, [#allocation3], %s177_s12, %s177_s12, %s178_s13  }
   0xe   :  { %s179_s16 = smov [#allocation5]  }
   0xf   :  { %s28_s17 = sshll.u32 %s179_s16, 4  ;;  %s29_s17 = int_to_ptr.vmem [resolvable:$true] %s28_s17 }
  0x10   :  { %s138_s18 = scalar_lea.vmem %s29_s17, 32  ;;  %p143_p6 = scmp.lt.s32.totalorder %s29_s17, %s29_s17 }
  0x11   :  { %p139_p5 = scmp.ne.s32.totalorder %s29_s17, %s138_s18  ;;  %p144_p7 = scmp.lt.s32.totalorder %s138_s18, %s138_s18 }
  0x13   :  { %p145_p8 = por %p144_p7, %p143_p6 }
  0x15   :  { %p146_p9 = pnand %p145_p8, %p139_p5 }
  0x17   :  { %149 = shalt.err (!%p146_p9)
}
  0x18   :  { %31 = dma.hbm_to_vmem [thread:$0]  %s212_s1, 32, %s29_s17, [#allocation6]  }
  0x19   :  { %170 = dma.done.wait [#allocation3], 512  }
  0x1a   :  { %171 = vsyncadd [#allocation3], 4294966784 }
  0x1b   :  { %172 = dma.done.wait [#allocation6], 32  }
  0x1c   :  { %173 = vsyncadd [#allocation6], 4294967264  ;;  %v38_v0 = vld [vmem:[#allocation2] sm:$0xff]  ;;  %v39_v1 = vld [vmem:[#allocation2 + $0x8] sm:$0xff]  ;;  %v65_v15 = vlaneseq  ;;  %s180_s0 = smov [#allocation7]  }
  0x1d   :  { %v40_v2 = vld [vmem:[#allocation2 + $0x10] sm:$0xff]  ;;  %v42_v3 = vmul.f32 %v38_v0, %v38_v0  ;;  %v43_v4 = vmul.f32 %v39_v1, %v39_v1  ;;  %v41_v5 = vld [vmem:[#allocation2 + $0x18] sm:$0xff]  ;;  %v59_v20 = vld [vmem:[#allocation5] sm:$0x3]  ;;  %s88_s1 = sshll.u32 %s180_s0, 4  ;;  %s89_s1 = int_to_ptr.vmem [resolvable:$true] %s88_s1 }
  0x1e   :  { %v44_v6 = vmul.f32 %v40_v2, %v40_v2  ;;  %v45_v7 = vmul.f32 %v41_v5, %v41_v5  ;;  %v66_v17 = vshrl.u32 %v65_v15, 7  ;;  %s150_s21 = scalar_lea.vmem %s89_s1, 512  ;;  %p155_p11 = scmp.lt.s32.totalorder %s89_s1, %s89_s1 }
  0x1f   :  { %v46_v8 = vadd.f32 %v43_v4, %v42_v3  ;;  %p151_p10 = scmp.ne.s32.totalorder %s89_s1, %s150_s21  ;;  %p156_p12 = scmp.lt.s32.totalorder %s150_s21, %s150_s21 }
  0x20   :  { %v49_v9 = vadd.f32 %v45_v7, %v44_v6  ;;  %v67_v18 = vsub.s32 0, %v66_v17  ;;  %v71_v19 = vsub.s32 1, %v66_v17 }
  0x21   :  { %47 = vadd.xlane.f32.xlu0 %v46_v8  ;;  %p157_p13 = por %p156_p12, %p155_p11 }
  0x22   :  { %v68_v21 = vrot.slane %v59_v20, %v67_v18  ;;  %v72_v22 = vrot.slane %v59_v20, %v71_v19 }
  0x23   :  { %p158_p0 = pnand %p157_p13, %p151_p10 }
  0x25   :  { %50 = vadd.xlane.f32.xlu0 %v49_v9 }
  0xaa   :  { %v48_v10 = vpop.xlane.xlu0 %47 }
  0xab   :  { %v53_v11 = vmul.f32 0.00390625, %v48_v10 }
  0xad   :  { %v55_v12 = vadd.f32 1e-05, %v53_v11 }
  0xae   :  { %v51_v13 = vpop.xlane.xlu0 %50 }
  0xaf   :  { %106 = vrsqrt.f32 %v55_v12  ;;  %v54_v14 = vmul.f32 0.00390625, %v51_v13 }
  0xb1   :  { %v56_v16 = vadd.f32 1e-05, %v54_v14 }
  0xb3   :  { %108 = vrsqrt.f32 %v56_v16 }
  0xbc   :  { %v107_v23 = vpop.eup %106 }
  0xbd   :  { %v60_v24 = vmul.f32 %v107_v23, %v38_v0  ;;  %v61_v25 = vmul.f32 %v107_v23, %v39_v1 }
  0xbf   :  { %v75_v26 = vmul.f32 %v68_v21, %v60_v24  ;;  %v76_v27 = vmul.f32 %v72_v22, %v61_v25 }
  0xc0   :  { %v109_v28 = vpop.eup %108 }
  0xc1   :  { %v62_v29 = vmul.f32 %v109_v28, %v40_v2  ;;  %v63_v30 = vmul.f32 %v109_v28, %v41_v5  ;;  %79 = vst [vmem:[#allocation7] sm:$0xff] %v75_v26  ;;  %80 = vst [vmem:[#allocation7 + $0x8] sm:$0xff] %v76_v27 }
  0xc3   :  { %v77_v31 = vmul.f32 %v68_v21, %v62_v29  ;;  %v78_v32 = vmul.f32 %v72_v22, %v63_v30 }
  0xc5   :  { %81 = vst [vmem:[#allocation7 + $0x10] sm:$0xff] %v77_v31  ;;  %82 = vst [vmem:[#allocation7 + $0x18] sm:$0xff] %v78_v32 }
  0xc6   :  { %161 = shalt.err (!%p158_p0)
}
  0xc7   :  { %94 = dma.vmem_to_hbm [thread:$0]  %s89_s1, 512, %s213_s2, [#allocation4], %s177_s12, %s177_s12, %s178_s13  }
  0xc8   :  { %174 = dma.done.wait [#allocation4], 512  }
  0xc9   :  { %175 = vsyncadd [#allocation4], 4294966784 }
  0xca   :  { %98 = vsyncpa [#allocation3], 1 }
  0xcb   :  { %99 = vsyncpa [#allocation6], 1 }
  0xcc   :  { %100 = vsyncpa [#allocation4], 1 }

</bundles_post_ra>
